<compile_context>
chip_gen: v6e
topology: v6e:2x2x1
jax: 0.10.0
libtpu: 0.0.40
codegen_flags: <defaults>
</compile_context>

<pallas_src>
import jax
import jax.numpy as jnp
import numpy as np
from jax.experimental import pallas as pl
from jax.experimental.pallas import tpu as pltpu

HIDDEN = 256  # fixed by nn.Linear(feature_size, 256) in AttentionModule


def stream_kernel(x_ref, w1_ref, b1_ref, w2bd_ref, b2_ref, attn_ref, wf_ref):
    # x_ref   : (B, T, F)     input feature segments
    # w1_ref  : (F, C*H)      fused, lane-dense first-layer weight
    # b1_ref  : (1, C*H)      fused first-layer bias
    # w2bd_ref: (C*H, C)      block-diagonal second-layer weight
    # b2_ref  : (1, C)        second-layer bias
    # attn_ref: (B, T, C)     attention, final PyTorch layout
    # wf_ref  : (B, C, F)     weighted features, final PyTorch layout
    B, T, F = x_ref.shape
    C = b2_ref.shape[1]
    BT = B * T

    x3 = x_ref[...]                       # (B, T, F)
    x2 = x3.reshape(BT, F)                # leading-dim merge (layout preserving)

    # ---- Layer 1: one fused MXU matmul over all classes (N = C*H, lane dense).
    h = jnp.dot(x2, w1_ref[...], preferred_element_type=jnp.float32)   # (BT, C*H)
    h = jnp.maximum(h + b1_ref[...], 0.0)

    # ---- Layer 2: block-diagonal MXU matmul (C*H -> C). logits[bt, c] only
    # sees the c-th 256-wide chunk of h because w2bd is zero off the diagonal.
    logits = jnp.dot(h, w2bd_ref[...], preferred_element_type=jnp.float32)  # (BT, C)
    a = jax.nn.sigmoid(logits + b2_ref[...])                                # (BT, C)

    # Attention in final (B, T, C) layout (leading-dim split only).
    a3 = a.reshape(B, T, C)
    attn_ref[...] = a3.astype(attn_ref.dtype)

    # ---- Attention-weighted temporal pooling:
    #   wf[b, c, f] = sum_t a[b, t, c] * x[b, t, f]
    # Static unroll over classes (C is tiny); single dense store at the end.
    sub_c = jax.lax.broadcasted_iota(jnp.int32, (B, C, F), 1)
    wf = jnp.zeros((B, C, F), jnp.float32)
    for c in range(C):
        a_c = a3[:, :, c:c + 1]                              # (B, T, 1) lane slice
        wf_c = jnp.sum(a_c * x3, axis=1, keepdims=True)      # (B, 1, F)
        wf = jnp.where(sub_c == c, wf_c, wf)                 # place in class row c
    wf_ref[...] = wf.astype(wf_ref.dtype)


@jax.jit
def stream_forward(x, w1, b1, w2, b2):
    """x: (B,T,F); w1: (C,H,F); b1: (C,H); w2: (C,H); b2: (C,)."""
    B, T, F = x.shape
    C, H, _ = w1.shape

    # Trace-time parameter re-layout (parameters only, done once under jit):
    #   W1 -> (F, C*H) so the kernel's layer-1 MXU operand is lane-dense.
    w1f = jnp.transpose(w1, (2, 0, 1)).reshape(F, C * H)
    b1f = b1.reshape(1, C * H)
    #   W2 -> block-diagonal (C*H, C): w2bd[c*H + j, c] = w2[c, j], 0 elsewhere.
    w2bd = (w2[:, :, None] * jnp.eye(C, dtype=w2.dtype)[:, None, :]).reshape(C * H, C)
    b2r = b2.reshape(1, C)

    vmem = lambda: pl.BlockSpec(memory_space=pltpu.MemorySpace.VMEM)
    attention, weighted = pl.pallas_call(
        stream_kernel,
        out_shape=(
            jax.ShapeDtypeStruct((B, T, C), jnp.float32),   # attention
            jax.ShapeDtypeStruct((B, C, F), jnp.float32),   # weighted_features
        ),
        in_specs=[vmem() for _ in range(5)],
        out_specs=(vmem(), vmem()),
    )(x, w1f, b1f, w2bd, b2r)
    return weighted, attention


def reference(x, w1, b1, w2, b2):
    """Pure-JAX reference matching the PyTorch StreamModule.forward semantics."""
    h = jnp.maximum(jnp.einsum("btf,chf->cbth", x, w1) + b1[:, None, None, :], 0.0)
    logits = jnp.einsum("cbth,ch->cbt", h, w2) + b2[:, None, None]
    attention = jnp.transpose(jax.nn.sigmoid(logits), (1, 2, 0))   # (B, T, C)
    weighted = jnp.einsum("btc,btf->bcf", attention, x)            # (B, C, F)
    return weighted, attention


if __name__ == "__main__":
    B, T, F, C = 2, 8, 32, 4  # batch, temporal segments, feature_size, num_classes

    key = jax.random.PRNGKey(0)
    kx, k1, k2, k3, k4 = jax.random.split(key, 5)

    x = jax.random.normal(kx, (B, T, F), dtype=jnp.float32)

    # Deterministic "Linear"-style params (uniform, scaled by fan-in).
    w1 = jax.random.uniform(k1, (C, HIDDEN, F), jnp.float32, -1.0, 1.0) / np.sqrt(F)
    b1 = jax.random.uniform(k2, (C, HIDDEN), jnp.float32, -1.0, 1.0) / np.sqrt(F)
    w2 = jax.random.uniform(k3, (C, HIDDEN), jnp.float32, -1.0, 1.0) / np.sqrt(HIDDEN)
    b2 = jax.random.uniform(k4, (C,), jnp.float32, -1.0, 1.0) / np.sqrt(HIDDEN)

    weighted, attention = stream_forward(x, w1, b1, w2, b2)
    jax.block_until_ready((weighted, attention))

    ref_w, ref_a = reference(x, w1, b1, w2, b2)
    np.testing.assert_allclose(np.asarray(attention), np.asarray(ref_a),
                               rtol=1e-4, atol=1e-4)
    np.testing.assert_allclose(np.asarray(weighted), np.asarray(ref_w),
                               rtol=1e-4, atol=1e-4)

    assert weighted.shape == (B, C, F) and attention.shape == (B, T, C)
    print("KERNEL_OK")
</pallas_src>

<mosaic_0001>
module attributes {stable_mosaic.version = 11 : i64} {
  func.func @stream_kernel(%arg0: memref<2x8x32xf32, #tpu.memory_space<vmem>>, %arg1: memref<32x1024xf32, #tpu.memory_space<vmem>>, %arg2: memref<1x1024xf32, #tpu.memory_space<vmem>>, %arg3: memref<1024x4xf32, #tpu.memory_space<vmem>>, %arg4: memref<1x4xf32, #tpu.memory_space<vmem>>, %arg5: memref<2x8x4xf32, #tpu.memory_space<vmem>>, %arg6: memref<2x4x32xf32, #tpu.memory_space<vmem>>) attributes {dimension_semantics = [], scalar_prefetch = 0 : i64, scratch_operands = 0 : i64, tpu.core_type = #tpu.core_type<tc>} {
    %c0 = arith.constant 0 : index
    %c0_0 = arith.constant 0 : index
    %c0_1 = arith.constant 0 : index
    %0 = vector.load %arg0[%c0, %c0_0, %c0_1] : memref<2x8x32xf32, #tpu.memory_space<vmem>>, vector<2x8x32xf32>
    %1 = vector.shape_cast %0 : vector<2x8x32xf32> to vector<16x32xf32>
    %c0_2 = arith.constant 0 : index
    %c0_3 = arith.constant 0 : index
    %2 = vector.load %arg1[%c0_2, %c0_3] : memref<32x1024xf32, #tpu.memory_space<vmem>>, vector<32x1024xf32>
    %cst = arith.constant dense<0.000000e+00> : vector<16x1024xf32>
    %3 = tpu.matmul %1, %2, %cst {dimension_numbers = #tpu.dot_dimension_numbers<[1], [0], [0], [1], [0, 0, 1, 1], [], []>} : vector<16x32xf32>, vector<32x1024xf32>, vector<16x1024xf32> -> vector<16x1024xf32>
    %c0_4 = arith.constant 0 : index
    %c0_5 = arith.constant 0 : index
    %4 = vector.load %arg2[%c0_4, %c0_5] : memref<1x1024xf32, #tpu.memory_space<vmem>>, vector<1x1024xf32>
    %5 = vector.broadcast %4 : vector<1x1024xf32> to vector<16x1024xf32>
    %6 = arith.addf %3, %5 : vector<16x1024xf32>
    %cst_6 = arith.constant 0.000000e+00 : f32
    %7 = vector.broadcast %cst_6 : f32 to vector<16x1024xf32>
    %8 = arith.maximumf %6, %7 : vector<16x1024xf32>
    %c0_7 = arith.constant 0 : index
    %c0_8 = arith.constant 0 : index
    %9 = vector.load %arg3[%c0_7, %c0_8] : memref<1024x4xf32, #tpu.memory_space<vmem>>, vector<1024x4xf32>
    %cst_9 = arith.constant dense<0.000000e+00> : vector<16x4xf32>
    %10 = tpu.matmul %8, %9, %cst_9 {dimension_numbers = #tpu.dot_dimension_numbers<[1], [0], [0], [1], [0, 0, 1, 1], [], []>} : vector<16x1024xf32>, vector<1024x4xf32>, vector<16x4xf32> -> vector<16x4xf32>
    %c0_10 = arith.constant 0 : index
    %c0_11 = arith.constant 0 : index
    %11 = vector.load %arg4[%c0_10, %c0_11] : memref<1x4xf32, #tpu.memory_space<vmem>>, vector<1x4xf32>
    %12 = vector.broadcast %11 : vector<1x4xf32> to vector<16x4xf32>
    %13 = arith.addf %10, %12 : vector<16x4xf32>
    %14 = arith.negf %13 : vector<16x4xf32>
    %15 = math.exp %14 : vector<16x4xf32>
    %cst_12 = arith.constant 1.000000e+00 : f32
    %16 = vector.broadcast %cst_12 : f32 to vector<16x4xf32>
    %17 = arith.addf %16, %15 : vector<16x4xf32>
    %18 = arith.divf %16, %17 : vector<16x4xf32>
    %19 = vector.shape_cast %18 : vector<16x4xf32> to vector<2x8x4xf32>
    %c0_13 = arith.constant 0 : index
    %c0_14 = arith.constant 0 : index
    %c0_15 = arith.constant 0 : index
    %20 = vector.load %arg5[%c0_13, %c0_14, %c0_15] : memref<2x8x4xf32, #tpu.memory_space<vmem>>, vector<2x8x4xf32>
    tpu.vector_store %arg5[%c0_13, %c0_14, %c0_15], %19 {strides = array<i32>} : memref<2x8x4xf32, #tpu.memory_space<vmem>>, vector<2x8x4xf32>,
    %21 = tpu.iota {dimensions = array<i32: 1>} : vector<2x4x32xi32>
    %cst_16 = arith.constant 0.000000e+00 : f32
    %22 = vector.broadcast %cst_16 : f32 to vector<2x4x32xf32>
    %23 = vector.extract_strided_slice %19 {offsets = [0, 0, 0], sizes = [2, 8, 1], strides = [1, 1, 1]} : vector<2x8x4xf32> to vector<2x8x1xf32>
    %24 = vector.broadcast %23 : vector<2x8x1xf32> to vector<2x8x32xf32>
    %25 = arith.mulf %24, %0 : vector<2x8x32xf32>
    %cst_17 = arith.constant dense<0.000000e+00> : vector<2x32xf32>
    %26 = vector.multi_reduction <add>, %25, %cst_17 [1] : vector<2x8x32xf32> to vector<2x32xf32>
    %27 = vector.shape_cast %26 : vector<2x32xf32> to vector<2x1x32xf32>
    %c0_i32 = arith.constant 0 : i32
    %28 = vector.broadcast %c0_i32 : i32 to vector<2x4x32xi32>
    %29 = arith.cmpi eq, %21, %28 : vector<2x4x32xi32>
    %30 = vector.shape_cast %27 : vector<2x1x32xf32> to vector<2x1x32xf32>
    %31 = vector.broadcast %30 : vector<2x1x32xf32> to vector<2x4x32xf32>
    %32 = arith.select %29, %31, %22 : vector<2x4x32xi1>, vector<2x4x32xf32>
    %33 = vector.extract_strided_slice %19 {offsets = [0, 0, 1], sizes = [2, 8, 1], strides = [1, 1, 1]} : vector<2x8x4xf32> to vector<2x8x1xf32>
    %34 = vector.broadcast %33 : vector<2x8x1xf32> to vector<2x8x32xf32>
    %35 = arith.mulf %34, %0 : vector<2x8x32xf32>
    %cst_18 = arith.constant dense<0.000000e+00> : vector<2x32xf32>
    %36 = vector.multi_reduction <add>, %35, %cst_18 [1] : vector<2x8x32xf32> to vector<2x32xf32>
    %37 = vector.shape_cast %36 : vector<2x32xf32> to vector<2x1x32xf32>
    %c1_i32 = arith.constant 1 : i32
    %38 = vector.broadcast %c1_i32 : i32 to vector<2x4x32xi32>
    %39 = arith.cmpi eq, %21, %38 : vector<2x4x32xi32>
    %40 = vector.shape_cast %37 : vector<2x1x32xf32> to vector<2x1x32xf32>
    %41 = vector.broadcast %40 : vector<2x1x32xf32> to vector<2x4x32xf32>
    %42 = arith.select %39, %41, %32 : vector<2x4x32xi1>, vector<2x4x32xf32>
    %43 = vector.extract_strided_slice %19 {offsets = [0, 0, 2], sizes = [2, 8, 1], strides = [1, 1, 1]} : vector<2x8x4xf32> to vector<2x8x1xf32>
    %44 = vector.broadcast %43 : vector<2x8x1xf32> to vector<2x8x32xf32>
    %45 = arith.mulf %44, %0 : vector<2x8x32xf32>
    %cst_19 = arith.constant dense<0.000000e+00> : vector<2x32xf32>
    %46 = vector.multi_reduction <add>, %45, %cst_19 [1] : vector<2x8x32xf32> to vector<2x32xf32>
    %47 = vector.shape_cast %46 : vector<2x32xf32> to vector<2x1x32xf32>
    %c2_i32 = arith.constant 2 : i32
    %48 = vector.broadcast %c2_i32 : i32 to vector<2x4x32xi32>
    %49 = arith.cmpi eq, %21, %48 : vector<2x4x32xi32>
    %50 = vector.shape_cast %47 : vector<2x1x32xf32> to vector<2x1x32xf32>
    %51 = vector.broadcast %50 : vector<2x1x32xf32> to vector<2x4x32xf32>
    %52 = arith.select %49, %51, %42 : vector<2x4x32xi1>, vector<2x4x32xf32>
    %53 = vector.extract_strided_slice %19 {offsets = [0, 0, 3], sizes = [2, 8, 1], strides = [1, 1, 1]} : vector<2x8x4xf32> to vector<2x8x1xf32>
    %54 = vector.broadcast %53 : vector<2x8x1xf32> to vector<2x8x32xf32>
    %55 = arith.mulf %54, %0 : vector<2x8x32xf32>
    %cst_20 = arith.constant dense<0.000000e+00> : vector<2x32xf32>
    %56 = vector.multi_reduction <add>, %55, %cst_20 [1] : vector<2x8x32xf32> to vector<2x32xf32>
    %57 = vector.shape_cast %56 : vector<2x32xf32> to vector<2x1x32xf32>
    %c3_i32 = arith.constant 3 : i32
    %58 = vector.broadcast %c3_i32 : i32 to vector<2x4x32xi32>
    %59 = arith.cmpi eq, %21, %58 : vector<2x4x32xi32>
    %60 = vector.shape_cast %57 : vector<2x1x32xf32> to vector<2x1x32xf32>
    %61 = vector.broadcast %60 : vector<2x1x32xf32> to vector<2x4x32xf32>
    %62 = arith.select %59, %61, %52 : vector<2x4x32xi1>, vector<2x4x32xf32>
    %c0_21 = arith.constant 0 : index
    %c0_22 = arith.constant 0 : index
    %c0_23 = arith.constant 0 : index
    %63 = vector.load %arg6[%c0_21, %c0_22, %c0_23] : memref<2x4x32xf32, #tpu.memory_space<vmem>>, vector<2x4x32xf32>
    tpu.vector_store %arg6[%c0_21, %c0_22, %c0_23], %62 {strides = array<i32>} : memref<2x4x32xf32, #tpu.memory_space<vmem>>, vector<2x4x32xf32>,
    return
  }
}

</mosaic_0001>

<bundles_post_ra>
// kernel: stream_forward.1
= control target key start
LH: loop header
LB: loop body
LE: loop exit
PB: predicated region body
PF: predicated region fallthrough
CT: control target
= control target key end

     0   :  { %vm99_vm0 = vcmask 261120   ;;  %v1223_v17 = vmov 0.0   ;;  %s1853_s0 = inlined_call_operand.vmem [shape: f32[2,8,32], index: 0, kind: input, shape index: {}]   ;;  %s1854_s1 = inlined_call_operand.vmem [shape: f32[32,1024], index: 1, kind: input, shape index: {}]   ;;  %s1855_s2 = inlined_call_operand.vmem [shape: f32[1,1024], index: 2, kind: input, shape index: {}]   ;;  %s1856_s3 = inlined_call_operand.vmem [shape: f32[1024,4], index: 3, kind: input, shape index: {}]   ;;  %s1857_s4 = inlined_call_operand.vmem [shape: f32[1,4], index: 4, kind: input, shape index: {}]   ;;  %s1858_s5 = inlined_call_operand.vmem [shape: f32[2,8,4], index: 5, kind: output, shape index: {0}]   ;;  %s1859_s6 = inlined_call_operand.hbm [shape: f32[2,4,32], index: 6, kind: output, shape index: {1}]  }
   0x1   :  { %v50_v0 = vld [vmem:[%s1854_s1 + $0xc8] sm:$0xff]  ;;  %v52_v1 = vld [vmem:[%s1854_s1 + $0xd8] sm:$0xff]  ;;  %v49_v2 = vld [vmem:[%s1854_s1 + $0xc0] sm:$0xff]  ;;  %170 = vmatprep.mubr.f32.mxu0 %v1223_v17  ;;  %247 = vmatprep.mubr.f32.mxu1 %v1223_v17 }
   0x2   :  { %130 = vmatprep.subr.mxu0 %v50_v0  ;;  %207 = vmatprep.subr.mxu1 %v52_v1  ;;  %v51_v3 = vld [vmem:[%s1854_s1 + $0xd0] sm:$0xff]  ;;  %v42_v4 = vld [vmem:[%s1854_s1 + $0x88] sm:$0xff]  ;;  %v44_v5 = vld [vmem:[%s1854_s1 + $0x98] sm:$0xff] }
   0x3   :  { %131 = vmatpush1.msra.mxu0 %v49_v2  ;;  %208 = vmatpush1.msra.mxu1 %v51_v3  ;;  %v41_v6 = vld [vmem:[%s1854_s1 + $0x80] sm:$0xff]  ;;  %v43_v7 = vld [vmem:[%s1854_s1 + $0x90] sm:$0xff]  ;;  %v34_v8 = vld [vmem:[%s1854_s1 + $0x48] sm:$0xff] }
   0x4   :  { %132 = vmatprep.subr.mxu0 %v42_v4  ;;  %209 = vmatprep.subr.mxu1 %v44_v5  ;;  %v36_v9 = vld [vmem:[%s1854_s1 + $0x58] sm:$0xff]  ;;  %v33_v10 = vld [vmem:[%s1854_s1 + $0x40] sm:$0xff]  ;;  %v35_v11 = vld [vmem:[%s1854_s1 + $0x50] sm:$0xff] }
   0x5   :  { %133 = vmatpush1.msra.mxu0 %v41_v6  ;;  %210 = vmatpush1.msra.mxu1 %v43_v7  ;;  %v26_v12 = vld [vmem:[%s1854_s1 + $0x8] sm:$0xff]  ;;  %v28_v13 = vld [vmem:[%s1854_s1 + $0x18] sm:$0xff]  ;;  %v25_v14 = vld [vmem:[%s1854_s1] sm:$0xff] }
   0x6   :  { %134 = vmatprep.subr.mxu0 %v34_v8  ;;  %211 = vmatprep.subr.mxu1 %v36_v9  ;;  %v27_v15 = vld [vmem:[%s1854_s1 + $0x10] sm:$0xff]  ;;  %v1317_v16 = vld [vmem:[%s1853_s0] sm:$0xff]  ;;  %v54_v18 = vld [vmem:[%s1854_s1 + $0xe8] sm:$0xff] }
   0x7   :  { %135 = vmatpush1.msra.mxu0 %v33_v10  ;;  %212 = vmatpush1.msra.mxu1 %v35_v11  ;;  %v53_v19 = vld [vmem:[%s1854_s1 + $0xe0] sm:$0xff]  ;;  %v46_v20 = vld [vmem:[%s1854_s1 + $0xa8] sm:$0xff]  ;;  %v56_v21 = vld [vmem:[%s1854_s1 + $0xf8] sm:$0xff] }
   0x8   :  { %136 = vmatprep.subr.mxu0 %v26_v12  ;;  %213 = vmatprep.subr.mxu1 %v28_v13  ;;  %v1338_v22 = vld [vmem:[%s1853_s0 + $0x8] sm:$0xff]  ;;  %v45_v23 = vld [vmem:[%s1854_s1 + $0xa0] sm:$0xff]  ;;  %v55_v24 = vld [vmem:[%s1854_s1 + $0xf0] sm:$0xff] }
   0x9   :  { %137 = vmatpush1.msra.mxu0 %v25_v14  ;;  %214 = vmatpush1.msra.mxu1 %v27_v15  ;;  %v38_v25 = vld [vmem:[%s1854_s1 + $0x68] sm:$0xff]  ;;  %v48_v26 = vld [vmem:[%s1854_s1 + $0xb8] sm:$0xff]  ;;  %v37_v27 = vld [vmem:[%s1854_s1 + $0x60] sm:$0xff] }
   0xa   :  { %1015 = vmatmul.mubr.msk.f32.vlgmr.msra.gmra.mxu0 %vm99_vm0, %v1317_v16  ;;  %1017 = vmatmul.mubr.msk.f32.vlgmr.msra.gmra.mxu1 %vm99_vm0, %v1317_v16  ;;  %v47_v28 = vld [vmem:[%s1854_s1 + $0xb0] sm:$0xff]  ;;  %v30_v29 = vld [vmem:[%s1854_s1 + $0x28] sm:$0xff]  ;;  %v40_v30 = vld [vmem:[%s1854_s1 + $0x78] sm:$0xff] }
   0xb   :  { %176 = vmatprep.mubr.f32.mxu0 %v1223_v17  ;;  %284 = vmatprep.subr.mxu0 %v54_v18  ;;  %v29_v31 = vld [vmem:[%s1854_s1 + $0x20] sm:$0xff]  ;;  %v39_v32 = vld [vmem:[%s1854_s1 + $0x70] sm:$0xff]  ;;  %v32_v33 = vld [vmem:[%s1854_s1 + $0x38] sm:$0xff] }
   0xc   :  { %285 = vmatpush1.msra.mxu0 %v53_v19  ;;  %253 = vmatprep.mubr.f32.mxu1 %v1223_v17  ;;  %v31_v34 = vld [vmem:[%s1854_s1 + $0x30] sm:$0xff]  ;;  %v461_v35 = vld [vmem:[%s1856_s3 + $0xf8] sm:$0xff]  ;;  %v459_v43 = vld [vmem:[%s1856_s3 + $0xe8] sm:$0xff] }
   0xd   :  { %286 = vmatprep.subr.mxu0 %v46_v20  ;;  %361 = vmatprep.subr.mxu1 %v56_v21  ;;  %v493_v36 = vld [vmem:[%s1856_s3 + $0x1f8] sm:$0xff]  ;;  %v460_v39 = vld [vmem:[%s1856_s3 + $0xf0] sm:$0xff]  ;;  %v491_v44 = vld [vmem:[%s1856_s3 + $0x1e8] sm:$0xff] }
   0xe   :  { %1016 = vmatmul.mubr.msk.f32.gmra.mxu0 %vm99_vm0, %v1338_v22  ;;  %1018 = vmatmul.mubr.msk.f32.gmra.mxu1 %vm99_vm0, %v1338_v22  ;;  %v445_v37 = vld [vmem:[%s1856_s3 + $0x78] sm:$0xff]  ;;  %v492_v40 = vld [vmem:[%s1856_s3 + $0x1f0] sm:$0xff]  ;;  %v443_v45 = vld [vmem:[%s1856_s3 + $0x68] sm:$0xff] }
   0xf   :  { %287 = vmatpush1.msra.mxu0 %v45_v23  ;;  %362 = vmatpush1.msra.mxu1 %v55_v24  ;;  %v477_v38 = vld [vmem:[%s1856_s3 + $0x178] sm:$0xff]  ;;  %v444_v41 = vld [vmem:[%s1856_s3 + $0x70] sm:$0xff]  ;;  %v475_v46 = vld [vmem:[%s1856_s3 + $0x168] sm:$0xff] }
  0x10   :  { %288 = vmatprep.subr.mxu0 %v38_v25  ;;  %363 = vmatprep.subr.mxu1 %v48_v26  ;;  %v476_v42 = vld [vmem:[%s1856_s3 + $0x170] sm:$0xff]  ;;  %v458_v47 = vld [vmem:[%s1856_s3 + $0xe0] sm:$0xff] }
  0x11   :  { %289 = vmatpush1.msra.mxu0 %v37_v27  ;;  %364 = vmatpush1.msra.mxu1 %v47_v28  ;;  %v490_v48 = vld [vmem:[%s1856_s3 + $0x1e0] sm:$0xff] }
  0x12   :  { %290 = vmatprep.subr.mxu0 %v30_v29  ;;  %365 = vmatprep.subr.mxu1 %v40_v30 }
  0x13   :  { %291 = vmatpush1.msra.mxu0 %v29_v31  ;;  %324 = vmatprep.mubr.f32.mxu0 %v1223_v17 }
  0x14   :  { %366 = vmatpush1.msra.mxu1 %v39_v32  ;;  %1019 = vmatmul.mubr.msk.f32.vlgmr.msra.gmra.mxu0 %vm99_vm0, %v1317_v16 }
  0x15   :  { %367 = vmatprep.subr.mxu1 %v32_v33  ;;  %401 = vmatprep.mubr.f32.mxu1 %v1223_v17 }
  0x16   :  { %368 = vmatpush1.msra.mxu1 %v31_v34  ;;  %330 = vmatprep.mubr.f32.mxu0 %v1223_v17 }
  0x17   :  { %1021 = vmatmul.mubr.msk.f32.vlgmr.msra.gmra.mxu1 %vm99_vm0, %v1317_v16  ;;  %1026 = vmatprep.subr.mxu0 %v461_v35 }
  0x18   :  { %1020 = vmatmul.mubr.msk.f32.gmra.mxu0 %vm99_vm0, %v1338_v22  ;;  %407 = vmatprep.mubr.f32.mxu1 %v1223_v17 }
  0x19   :  { %1064 = vmatprep.subr.mxu1 %v493_v36  ;;  %1027 = vmatpush3.msra.mxu0 %v445_v37 }
  0x1a   :  { %1065 = vmatpush3.msra.mxu1 %v477_v38  ;;  %1028 = vmatprep.subr.mxu0 %v460_v39 }
  0x1b   :  { %1022 = vmatmul.mubr.msk.f32.gmra.mxu1 %vm99_vm0, %v1338_v22  ;;  %1066 = vmatprep.subr.mxu1 %v492_v40 }
  0x1c   :  { %1029 = vmatpush3.msra.mxu0 %v444_v41  ;;  %1067 = vmatpush3.msra.mxu1 %v476_v42 }
  0x1d   :  { %12 = vsyncpa [#allocation3], 0  ;;  %1030 = vmatprep.subr.mxu0 %v459_v43  ;;  %1068 = vmatprep.subr.mxu1 %v491_v44  ;;  %v442_v49 = vld [vmem:[%s1856_s3 + $0x60] sm:$0xff]  ;;  %v457_v51 = vld [vmem:[%s1856_s3 + $0xd8] sm:$0xff]  ;;  %v59_v39 = vlaneseq  ;;  %vm877_vm1 = vcmask 31744   ;;  %vm992_vm6 = vcmask 257024  }
  0x1e   :  { %v474_v50 = vld [vmem:[%s1856_s3 + $0x160] sm:$0xff]  ;;  %1031 = vmatpush3.msra.mxu0 %v443_v45  ;;  %1069 = vmatpush3.msra.mxu1 %v475_v46  ;;  %v489_v52 = vld [vmem:[%s1856_s3 + $0x1d8] sm:$0xff]  ;;  %v456_v55 = vld [vmem:[%s1856_s3 + $0xd0] sm:$0xff] }
  0x1f   :  { %1032 = vmatprep.subr.mxu0 %v458_v47  ;;  %1070 = vmatprep.subr.mxu1 %v490_v48  ;;  %v441_v53 = vld [vmem:[%s1856_s3 + $0x58] sm:$0xff]  ;;  %v488_v56 = vld [vmem:[%s1856_s3 + $0x1d0] sm:$0xff]  ;;  %v455_v59 = vld [vmem:[%s1856_s3 + $0xc8] sm:$0xff]  ;;  %v1586_v40 = vshrl.u32 %v59_v39, 7 }
  0x20   :  { %v473_v54 = vld [vmem:[%s1856_s3 + $0x158] sm:$0xff]  ;;  %1033 = vmatpush3.msra.mxu0 %v442_v49  ;;  %1071 = vmatpush3.msra.mxu1 %v474_v50  ;;  %v440_v57 = vld [vmem:[%s1856_s3 + $0x50] sm:$0xff]  ;;  %v487_v60 = vld [vmem:[%s1856_s3 + $0x1c8] sm:$0xff] }
  0x21   :  { %1034 = vmatprep.subr.mxu0 %v457_v51  ;;  %1072 = vmatprep.subr.mxu1 %v489_v52  ;;  %v472_v58 = vld [vmem:[%s1856_s3 + $0x150] sm:$0xff]  ;;  %v439_v61 = vld [vmem:[%s1856_s3 + $0x48] sm:$0xff]  ;;  %v454_v63 = vld [vmem:[%s1856_s3 + $0xc0] sm:$0xff]  ;;  %v69_v41 = vsub.s32 2, %v1586_v40  ;;  %v61_v42 = vsub.s32 0, %v1586_v40  ;;  %v65_v44 = vsub.s32 1, %v1586_v40 }
  0x22   :  { %1035 = vmatpush3.msra.mxu0 %v441_v53  ;;  %1073 = vmatpush3.msra.mxu1 %v473_v54  ;;  %v471_v62 = vld [vmem:[%s1856_s3 + $0x148] sm:$0xff]  ;;  %v486_v0 = vld [vmem:[%s1856_s3 + $0x1c0] sm:$0xff]  ;;  %v453_v3 = vld [vmem:[%s1856_s3 + $0xb8] sm:$0xff]  ;;  %v73_v45 = vsub.s32 3, %v1586_v40  ;;  %vm908_vm2 = vcmp.eq.s32.totalorder %v1586_v40, 0  ;;  %vm935_vm3 = vcmp.eq.s32.totalorder %v1586_v40, 1 }
  0x23   :  { %1036 = vmatprep.subr.mxu0 %v456_v55  ;;  %1074 = vmatprep.subr.mxu1 %v488_v56  ;;  %v438_v1 = vld [vmem:[%s1856_s3 + $0x40] sm:$0xff]  ;;  %v485_v4 = vld [vmem:[%s1856_s3 + $0x1b8] sm:$0xff]  ;;  %v452_v7 = vld [vmem:[%s1856_s3 + $0xb0] sm:$0xff]  ;;  %vm962_vm4 = vcmp.eq.s32.totalorder %v1586_v40, 2  ;;  %vm989_vm5 = vcmp.eq.s32.totalorder %v1586_v40, 3 }
  0x24   :  { %1037 = vmatpush3.msra.mxu0 %v440_v57  ;;  %1075 = vmatpush3.msra.mxu1 %v472_v58  ;;  %v470_v2 = vld [vmem:[%s1856_s3 + $0x140] sm:$0xff]  ;;  %v437_v5 = vld [vmem:[%s1856_s3 + $0x38] sm:$0xff]  ;;  %v484_v8 = vld [vmem:[%s1856_s3 + $0x1b0] sm:$0xff] }
  0x25   :  { %1038 = vmatprep.subr.mxu0 %v455_v59  ;;  %1076 = vmatprep.subr.mxu1 %v487_v60  ;;  %v469_v6 = vld [vmem:[%s1856_s3 + $0x138] sm:$0xff]  ;;  %v436_v9 = vld [vmem:[%s1856_s3 + $0x30] sm:$0xff]  ;;  %v451_v11 = vld [vmem:[%s1856_s3 + $0xa8] sm:$0xff] }
  0x26   :  { %1039 = vmatpush3.msra.mxu0 %v439_v61  ;;  %1077 = vmatpush3.msra.mxu1 %v471_v62  ;;  %v468_v10 = vld [vmem:[%s1856_s3 + $0x130] sm:$0xff]  ;;  %v483_v12 = vld [vmem:[%s1856_s3 + $0x1a8] sm:$0xff]  ;;  %v450_v15 = vld [vmem:[%s1856_s3 + $0xa0] sm:$0xff] }
  0x27   :  { %1040 = vmatprep.subr.mxu0 %v454_v63  ;;  %1078 = vmatprep.subr.mxu1 %v486_v0  ;;  %v435_v13 = vld [vmem:[%s1856_s3 + $0x28] sm:$0xff]  ;;  %v482_v17 = vld [vmem:[%s1856_s3 + $0x1a0] sm:$0xff]  ;;  %v449_v20 = vld [vmem:[%s1856_s3 + $0x98] sm:$0xff] }
  0x28   :  { %1041 = vmatpush3.msra.mxu0 %v438_v1  ;;  %1079 = vmatpush3.msra.mxu1 %v470_v2  ;;  %v467_v14 = vld [vmem:[%s1856_s3 + $0x128] sm:$0xff]  ;;  %v434_v18 = vld [vmem:[%s1856_s3 + $0x20] sm:$0xff]  ;;  %v481_v21 = vld [vmem:[%s1856_s3 + $0x198] sm:$0xff] }
  0x29   :  { %1042 = vmatprep.subr.mxu0 %v453_v3  ;;  %1080 = vmatprep.subr.mxu1 %v485_v4  ;;  %v466_v19 = vld [vmem:[%s1856_s3 + $0x120] sm:$0xff]  ;;  %v433_v23 = vld [vmem:[%s1856_s3 + $0x18] sm:$0xff]  ;;  %v448_v25 = vld [vmem:[%s1856_s3 + $0x90] sm:$0xff] }
  0x2a   :  { %1043 = vmatpush3.msra.mxu0 %v437_v5  ;;  %1081 = vmatpush3.msra.mxu1 %v469_v6  ;;  %v465_v24 = vld [vmem:[%s1856_s3 + $0x118] sm:$0xff]  ;;  %v480_v26 = vld [vmem:[%s1856_s3 + $0x190] sm:$0xff]  ;;  %v447_v29 = vld [vmem:[%s1856_s3 + $0x88] sm:$0xff] }
  0x2b   :  { %1044 = vmatprep.subr.mxu0 %v452_v7  ;;  %1082 = vmatprep.subr.mxu1 %v484_v8  ;;  %v432_v27 = vld [vmem:[%s1856_s3 + $0x10] sm:$0xff]  ;;  %v479_v30 = vld [vmem:[%s1856_s3 + $0x188] sm:$0xff]  ;;  %v446_v33 = vld [vmem:[%s1856_s3 + $0x80] sm:$0xff] }
  0x2c   :  { %1045 = vmatpush3.msra.mxu0 %v436_v9  ;;  %1083 = vmatpush3.msra.mxu1 %v468_v10  ;;  %v464_v28 = vld [vmem:[%s1856_s3 + $0x110] sm:$0xff]  ;;  %v431_v31 = vld [vmem:[%s1856_s3 + $0x8] sm:$0xff]  ;;  %v478_v34 = vld [vmem:[%s1856_s3 + $0x180] sm:$0xff] }
  0x2d   :  { %1046 = vmatprep.subr.mxu0 %v451_v11  ;;  %1084 = vmatprep.subr.mxu1 %v483_v12  ;;  %v463_v32 = vld [vmem:[%s1856_s3 + $0x108] sm:$0xff]  ;;  %v430_v35 = vld [vmem:[%s1856_s3] sm:$0xff]  ;;  %v525_v37 = vld [vmem:[%s1856_s3 + $0x2f8] sm:$0xff] }
  0x2e   :  { %1047 = vmatpush3.msra.mxu0 %v435_v13  ;;  %1085 = vmatpush3.msra.mxu1 %v467_v14  ;;  %v462_v36 = vld [vmem:[%s1856_s3 + $0x100] sm:$0xff]  ;;  %v557_v38 = vld [vmem:[%s1856_s3 + $0x3f8] sm:$0xff]  ;;  %v524_v0 = vld [vmem:[%s1856_s3 + $0x2f0] sm:$0xff] }
  0x2f   :  { %1048 = vmatprep.subr.mxu0 %v450_v15  ;;  %1086 = vmatprep.subr.mxu1 %v482_v17  ;;  %v1593_v43 = vld [vmem:[%s1855_s2] sm:$0xff]  ;;  %v509_v62 = vld [vmem:[%s1856_s3 + $0x278] sm:$0xff]  ;;  %v556_v1 = vld [vmem:[%s1856_s3 + $0x3f0] sm:$0xff] }
  0x30   :  { %1049 = vmatpush3.msra.mxu0 %v434_v18  ;;  %1087 = vmatpush3.msra.mxu1 %v466_v19  ;;  %v1598_v46 = vrot.slane %v1593_v43, %v69_v41  ;;  %v1601_v47 = vrot.slane %v1593_v43, %v61_v42  ;;  %v1604_v48 = vrot.slane %v1593_v43, %v65_v44  ;;  %v541_v63 = vld [vmem:[%s1856_s3 + $0x378] sm:$0xff]  ;;  %v508_v2 = vld [vmem:[%s1856_s3 + $0x270] sm:$0xff]  ;;  %v523_v4 = vld [vmem:[%s1856_s3 + $0x2e8] sm:$0xff] }
  0x31   :  { %1050 = vmatprep.subr.mxu0 %v449_v20  ;;  %1088 = vmatprep.subr.mxu1 %v481_v21  ;;  %v1607_v49 = vrot.slane %v1593_v43, %v73_v45  ;;  %v540_v3 = vld [vmem:[%s1856_s3 + $0x370] sm:$0xff]  ;;  %v555_v5 = vld [vmem:[%s1856_s3 + $0x3e8] sm:$0xff]  ;;  %v522_v8 = vld [vmem:[%s1856_s3 + $0x2e0] sm:$0xff] }
  0x32   :  { %1051 = vmatpush3.msra.mxu0 %v433_v23  ;;  %1089 = vmatpush3.msra.mxu1 %v465_v24  ;;  %v507_v6 = vld [vmem:[%s1856_s3 + $0x268] sm:$0xff]  ;;  %v554_v9 = vld [vmem:[%s1856_s3 + $0x3e0] sm:$0xff]  ;;  %v521_v12 = vld [vmem:[%s1856_s3 + $0x2d8] sm:$0xff] }
  0x33   :  { %1052 = vmatprep.subr.mxu0 %v448_v25  ;;  %1090 = vmatprep.subr.mxu1 %v480_v26  ;;  %v539_v7 = vld [vmem:[%s1856_s3 + $0x368] sm:$0xff]  ;;  %v506_v10 = vld [vmem:[%s1856_s3 + $0x260] sm:$0xff]  ;;  %v553_v13 = vld [vmem:[%s1856_s3 + $0x3d8] sm:$0xff] }
  0x34   :  { %1053 = vmatpush3.msra.mxu0 %v432_v27  ;;  %1091 = vmatpush3.msra.mxu1 %v464_v28  ;;  %v538_v11 = vld [vmem:[%s1856_s3 + $0x360] sm:$0xff]  ;;  %v505_v14 = vld [vmem:[%s1856_s3 + $0x258] sm:$0xff]  ;;  %v520_v17 = vld [vmem:[%s1856_s3 + $0x2d0] sm:$0xff] }
  0x35   :  { %1054 = vmatprep.subr.mxu0 %v447_v29  ;;  %1092 = vmatprep.subr.mxu1 %v479_v30  ;;  %v537_v15 = vld [vmem:[%s1856_s3 + $0x358] sm:$0xff]  ;;  %v552_v18 = vld [vmem:[%s1856_s3 + $0x3d0] sm:$0xff]  ;;  %v519_v24 = vld [vmem:[%s1856_s3 + $0x2c8] sm:$0xff] }
  0x36   :  { %1055 = vmatpush3.msra.mxu0 %v431_v31  ;;  %1093 = vmatpush3.msra.mxu1 %v463_v32  ;;  %v504_v21 = vld [vmem:[%s1856_s3 + $0x250] sm:$0xff]  ;;  %v551_v25 = vld [vmem:[%s1856_s3 + $0x3c8] sm:$0xff]  ;;  %v518_v28 = vld [vmem:[%s1856_s3 + $0x2c0] sm:$0xff] }
  0x37   :  { %1056 = vmatprep.subr.mxu0 %v446_v33  ;;  %1094 = vmatprep.subr.mxu1 %v478_v34  ;;  %v536_v23 = vld [vmem:[%s1856_s3 + $0x350] sm:$0xff]  ;;  %v503_v26 = vld [vmem:[%s1856_s3 + $0x248] sm:$0xff]  ;;  %v550_v29 = vld [vmem:[%s1856_s3 + $0x3c0] sm:$0xff] }
  0x38   :  { %1057 = vmatpush3.msra.mxu0 %v430_v35  ;;  %1095 = vmatpush3.msra.mxu1 %v462_v36  ;;  %v535_v27 = vld [vmem:[%s1856_s3 + $0x348] sm:$0xff]  ;;  %v502_v32 = vld [vmem:[%s1856_s3 + $0x240] sm:$0xff]  ;;  %v517_v34 = vld [vmem:[%s1856_s3 + $0x2b8] sm:$0xff] }
  0x39   :  { %1102 = vmatprep.subr.mxu0 %v525_v37  ;;  %1140 = vmatprep.subr.mxu1 %v557_v38  ;;  %v534_v33 = vld [vmem:[%s1856_s3 + $0x340] sm:$0xff]  ;;  %v549_v35 = vld [vmem:[%s1856_s3 + $0x3b8] sm:$0xff]  ;;  %v516_v44 = vld [vmem:[%s1856_s3 + $0x2b0] sm:$0xff] }
  0x3a   :  { %v501_v39 = vld [vmem:[%s1856_s3 + $0x238] sm:$0xff]  ;;  %v548_v45 = vld [vmem:[%s1856_s3 + $0x3b0] sm:$0xff] }
  0x3b   :  { %v533_v41 = vld [vmem:[%s1856_s3 + $0x338] sm:$0xff] }
  0xca   :  { %v172_v50 = vpop.f32.mrf.mxu0  ;;  %v249_v51 = vpop.f32.mrf.mxu1 }
  0xcb   :  { %v250_v52 = vadd.f32 %v249_v51, %v1598_v46  ;;  %v173_v53 = vadd.f32 %v172_v50, %v1601_v47  ;;  %v500_v50 = vld [vmem:[%s1856_s3 + $0x230] sm:$0xff] }
  0xcc   :  { %v174_v54 = vpop.f32.mrf.mxu0  ;;  %v251_v55 = vpop.f32.mrf.mxu1 }
  0xcd   :  { %v175_v56 = vadd.f32 %v174_v54, %v1604_v48  ;;  %v252_v57 = vadd.f32 %v251_v55, %v1607_v49  ;;  %v416_v58 = vmax.f32 %v250_v52, 0.0  ;;  %v414_v61 = vmax.f32 %v173_v53, 0.0  ;;  %v515_v52 = vld [vmem:[%s1856_s3 + $0x2a8] sm:$0xff] }
  0xce   :  { %v178_v19 = vpop.f32.mrf.mxu0  ;;  %v255_v20 = vpop.f32.mrf.mxu1  ;;  %v547_v53 = vld [vmem:[%s1856_s3 + $0x3a8] sm:$0xff] }
  0xcf   :  { %v415_v59 = vmax.f32 %v175_v56, 0.0  ;;  %v417_v60 = vmax.f32 %v252_v57, 0.0  ;;  %v179_v42 = vadd.f32 %v178_v19, %v1601_v47  ;;  %v532_v47 = vld [vmem:[%s1856_s3 + $0x330] sm:$0xff]  ;;  %v256_v57 = vadd.f32 %v255_v20, %v1598_v46 }
  0xd0   :  { %v180_v30 = vpop.f32.mrf.mxu0  ;;  %v257_v31 = vpop.f32.mrf.mxu1 }
  0xd1   :  { %629 = vmatprep.mubr.f32.mxu0 %v415_v59  ;;  %704 = vmatprep.mubr.f32.mxu1 %v417_v60  ;;  %v181_v38 = vadd.f32 %v180_v30, %v1604_v48  ;;  %v81_v48 = vsub.s32 5, %v1586_v40  ;;  %v258_v51 = vadd.f32 %v257_v31, %v1607_v49  ;;  %v531_v49 = vld [vmem:[%s1856_s3 + $0x328] sm:$0xff]  ;;  %v89_v59 = vsub.s32 7, %v1586_v40 }
  0xd2   :  { %630 = vmatmul.mubr.f32.vlgmr.msra.gmra.mxu0 %v414_v61  ;;  %705 = vmatmul.mubr.f32.vlgmr.msra.gmra.mxu1 %v416_v58  ;;  %v499_v58 = vld [vmem:[%s1856_s3 + $0x228] sm:$0xff]  ;;  %v422_v60 = vmax.f32 %v179_v42, 0.0  ;;  %v514_v61 = vld [vmem:[%s1856_s3 + $0x2a0] sm:$0xff] }
  0xd3   :  { %1103 = vmatpush3.msra.mxu0 %v509_v62  ;;  %1141 = vmatpush3.msra.mxu1 %v541_v63  ;;  %v423_v56 = vmax.f32 %v181_v38, 0.0  ;;  %v82_v46 = vrot.slane %v1593_v43, %v81_v48  ;;  %v85_v62 = vsub.s32 6, %v1586_v40  ;;  %v546_v63 = vld [vmem:[%s1856_s3 + $0x3a0] sm:$0xff]  ;;  %v527_v31 = vld [vmem:[%s1856_s3 + $0x308] sm:$0xff] }
  0xd4   :  { %1104 = vmatprep.subr.mxu0 %v524_v0  ;;  %1142 = vmatprep.subr.mxu1 %v556_v1  ;;  %v1709_v36 = vpop.f32.mrf.mxu0  ;;  %v425_v0 = vmax.f32 %v258_v51, 0.0  ;;  %v77_v1 = vsub.s32 4, %v1586_v40  ;;  %v526_v38 = vld [vmem:[%s1856_s3 + $0x300] sm:$0xff] }
  0xd5   :  { %1105 = vmatpush3.msra.mxu0 %v508_v2  ;;  %1143 = vmatpush3.msra.mxu1 %v540_v3  ;;  %v498_v2 = vld [vmem:[%s1856_s3 + $0x220] sm:$0xff] }
  0xd6   :  { %1106 = vmatprep.subr.mxu0 %v523_v4  ;;  %1144 = vmatprep.subr.mxu1 %v555_v5  ;;  %v328_v54 = vpop.f32.mrf.mxu0  ;;  %v530_v3 = vld [vmem:[%s1856_s3 + $0x320] sm:$0xff] }
  0xd7   :  { %1107 = vmatpush3.msra.mxu0 %v507_v6  ;;  %1145 = vmatpush3.msra.mxu1 %v539_v7  ;;  %v1711_v37 = vpop.f32.mrf.mxu1  ;;  %v424_v6 = vmax.f32 %v256_v57, 0.0  ;;  %v513_v7 = vld [vmem:[%s1856_s3 + $0x298] sm:$0xff] }
  0xd8   :  { %1108 = vmatprep.subr.mxu0 %v522_v8  ;;  %1146 = vmatprep.subr.mxu1 %v554_v9  ;;  %v332_v4 = vpop.f32.mrf.mxu0  ;;  %v90_v8 = vrot.slane %v1593_v43, %v89_v59  ;;  %v329_v9 = vadd.f32 %v328_v54, %v82_v46 }
  0xd9   :  { %1109 = vmatpush3.msra.mxu0 %v506_v10  ;;  %1147 = vmatpush3.msra.mxu1 %v538_v11  ;;  %v405_v55 = vpop.f32.mrf.mxu1  ;;  %v86_v10 = vrot.slane %v1593_v43, %v85_v62  ;;  %v545_v11 = vld [vmem:[%s1856_s3 + $0x398] sm:$0xff] }
  0xda   :  { %1110 = vmatprep.subr.mxu0 %v521_v12  ;;  %1148 = vmatprep.subr.mxu1 %v553_v13  ;;  %v497_v12 = vld [vmem:[%s1856_s3 + $0x218] sm:$0xff]  ;;  %v406_v20 = vadd.f32 %v405_v55, %v90_v8 }
  0xdb   :  { %1111 = vmatpush3.msra.mxu0 %v505_v14  ;;  %1149 = vmatpush3.msra.mxu1 %v537_v15  ;;  %v409_v5 = vpop.f32.mrf.mxu1  ;;  %v529_v13 = vld [vmem:[%s1856_s3 + $0x318] sm:$0xff]  ;;  %v78_v14 = vrot.slane %v1593_v43, %v77_v1  ;;  %v512_v15 = vld [vmem:[%s1856_s3 + $0x290] sm:$0xff] }
  0xdc   :  { %1112 = vmatprep.subr.mxu0 %v520_v17  ;;  %1150 = vmatprep.subr.mxu1 %v552_v18  ;;  %v544_v17 = vld [vmem:[%s1856_s3 + $0x390] sm:$0xff]  ;;  %v334_v18 = vpop.f32.mrf.mxu0 }
  0xdd   :  { %1113 = vmatpush3.msra.mxu0 %v504_v21  ;;  %1151 = vmatpush3.msra.mxu1 %v536_v23  ;;  %v411_v19 = vpop.f32.mrf.mxu1  ;;  %v496_v21 = vld [vmem:[%s1856_s3 + $0x210] sm:$0xff]  ;;  %v419_v23 = vmax.f32 %v329_v9, 0.0  ;;  %v327_v30 = vadd.f32 %v1709_v36, %v78_v14 }
  0xde   :  { %1114 = vmatprep.subr.mxu0 %v519_v24  ;;  %1152 = vmatprep.subr.mxu1 %v551_v25  ;;  %v528_v43 = vld [vmem:[%s1856_s3 + $0x310] sm:$0xff]  ;;  %v404_v24 = vadd.f32 %v1711_v37, %v86_v10  ;;  %v511_v25 = vld [vmem:[%s1856_s3 + $0x288] sm:$0xff]  ;;  %v410_v37 = vadd.f32 %v409_v5, %v86_v10 }
  0xdf   :  { %1115 = vmatpush3.msra.mxu0 %v503_v26  ;;  %1153 = vmatpush3.msra.mxu1 %v535_v27  ;;  %v543_v26 = vld [vmem:[%s1856_s3 + $0x388] sm:$0xff]  ;;  %v335_v27 = vadd.f32 %v334_v18, %v82_v46  ;;  %v418_v42 = vmax.f32 %v327_v30, 0.0 }
  0xe0   :  { %1116 = vmatprep.subr.mxu0 %v518_v28  ;;  %1154 = vmatprep.subr.mxu1 %v550_v29  ;;  %v495_v28 = vld [vmem:[%s1856_s3 + $0x208] sm:$0xff]  ;;  %v412_v29 = vadd.f32 %v411_v19, %v90_v8  ;;  %v420_v36 = vmax.f32 %v404_v24, 0.0 }
  0xe1   :  { %1117 = vmatpush3.msra.mxu0 %v502_v32  ;;  %1155 = vmatpush3.msra.mxu1 %v534_v33  ;;  %v510_v32 = vld [vmem:[%s1856_s3 + $0x280] sm:$0xff]  ;;  %v421_v33 = vmax.f32 %v406_v20, 0.0 }
  0xe2   :  { %1118 = vmatprep.subr.mxu0 %v517_v34  ;;  %1156 = vmatprep.subr.mxu1 %v549_v35  ;;  %v542_v34 = vld [vmem:[%s1856_s3 + $0x380] sm:$0xff] }
  0xe3   :  { %1119 = vmatpush3.msra.mxu0 %v501_v39  ;;  %1157 = vmatpush3.msra.mxu1 %v533_v41  ;;  %v494_v35 = vld [vmem:[%s1856_s3 + $0x200] sm:$0xff]  ;;  %v427_v39 = vmax.f32 %v335_v27, 0.0  ;;  %v429_v41 = vmax.f32 %v412_v29, 0.0  ;;  %v1226_v27 = vmov 2  }
  0xe4   :  { %1120 = vmatprep.subr.mxu0 %v516_v44  ;;  %1158 = vmatprep.subr.mxu1 %v548_v45  ;;  %v333_v44 = vadd.f32 %v332_v4, %v78_v14  ;;  %v428_v45 = vmax.f32 %v410_v37, 0.0 }
  0xe5   :  { %1121 = vmatpush3.msra.mxu0 %v500_v50  ;;  %1159 = vmatpush3.msra.mxu1 %v532_v47  ;;  %v1224_v50 = vmov 1   ;;  %v1225_v47 = vmov 0  }
  0xe6   :  { %1122 = vmatprep.subr.mxu0 %v515_v52  ;;  %1160 = vmatprep.subr.mxu1 %v547_v53  ;;  %v426_v48 = vmax.f32 %v333_v44, 0.0 }
  0xe7   :  { %1123 = vmatpush3.msra.mxu0 %v499_v58  ;;  %1161 = vmatpush3.msra.mxu1 %v531_v49  ;;  %v1023_v58 = vld [vmem:[%s1857_s4] ss:$0 sm:$0xff] }
  0xe8   :  { %634 = vmatprep.mubr.f32.mxu0 %v423_v56  ;;  %1124 = vmatprep.subr.mxu0 %v514_v61 }
  0xe9   :  { %1162 = vmatprep.subr.mxu1 %v546_v63  ;;  %635 = vmatmul.mubr.f32.gmra.mxu0 %v422_v60 }
  0xea   :  { %1125 = vmatpush3.msra.mxu0 %v498_v2  ;;  %1163 = vmatpush3.msra.mxu1 %v530_v3 }
  0xeb   :  { %709 = vmatprep.mubr.f32.mxu1 %v425_v0  ;;  %1126 = vmatprep.subr.mxu0 %v513_v7 }
  0xec   :  { %1164 = vmatprep.subr.mxu1 %v545_v11  ;;  %710 = vmatmul.mubr.f32.gmra.mxu1 %v424_v6 }
  0xed   :  { %1127 = vmatpush3.msra.mxu0 %v497_v12  ;;  %1165 = vmatpush3.msra.mxu1 %v529_v13 }
  0xee   :  { %1128 = vmatprep.subr.mxu0 %v512_v15  ;;  %1166 = vmatprep.subr.mxu1 %v544_v17 }
  0xef   :  { %1129 = vmatpush3.msra.mxu0 %v496_v21  ;;  %1167 = vmatpush3.msra.mxu1 %v528_v43 }
  0xf0   :  { %1130 = vmatprep.subr.mxu0 %v511_v25  ;;  %1168 = vmatprep.subr.mxu1 %v543_v26 }
  0xf1   :  { %1131 = vmatpush3.msra.mxu0 %v495_v28  ;;  %779 = vmatprep.mubr.f32.mxu0 %v419_v23  ;;  %v1227_v28 = vmov 3  }
  0xf2   :  { %1169 = vmatpush3.msra.mxu1 %v527_v31  ;;  %1132 = vmatprep.subr.mxu0 %v510_v32 }
  0xf3   :  { %1170 = vmatprep.subr.mxu1 %v542_v34  ;;  %1133 = vmatpush3.msra.mxu0 %v494_v35 }
  0xf4   :  { %1171 = vmatpush3.msra.mxu1 %v526_v38  ;;  %854 = vmatprep.mubr.f32.mxu1 %v421_v33 }
  0xf5   :  { %780 = vmatmul.mubr.f32.vlgmr.msra.gmra.mxu0 %v418_v42  ;;  %855 = vmatmul.mubr.f32.vlgmr.msra.gmra.mxu1 %v420_v36 }
  0xf6   :  { %784 = vmatprep.mubr.f32.mxu0 %v427_v39  ;;  %859 = vmatprep.mubr.f32.mxu1 %v429_v41 }
  0xf7   :  { %1187 = vset.pattern.permute.xlu1 %v1224_v50  ;;  %1186 = vset.pattern.permute.xlu0 %v1225_v47 }
  0xf9   :  { %785 = vmatmul.mubr.f32.gmra.mxu0 %v426_v48  ;;  %860 = vmatmul.mubr.f32.gmra.mxu1 %v428_v45 }
 0x192   :  { %v1058_v51 = vpop.f32.mrf.mxu0  ;;  %v1096_v52 = vpop.f32.mrf.mxu1 }
 0x194   :  { %v1059_v53 = vpop.f32.mrf.mxu0  ;;  %v1097_v54 = vpop.f32.mrf.mxu1 }
 0x195   :  { %v1060_v57 = vadd.f32 %v1059_v53, %v1058_v51  ;;  %v1098_v63 = vadd.f32 %v1097_v54, %v1096_v52 }
 0x197   :  { %v632_v60 = vadd.f32 %v1060_v57, %v1023_v58 }
 0x199   :  { %v707_v2 = vadd.f32 %v1098_v63, %v632_v60 }
 0x1a9   :  { %v1061_v55 = vpop.f32.mrf.mxu0 }
 0x1ab   :  { %v1062_v49 = vpop.f32.mrf.mxu0 }
 0x1ac   :  { %v1099_v56 = vpop.f32.mrf.mxu1  ;;  %v1063_v61 = vadd.f32 %v1062_v49, %v1061_v55 }
 0x1ae   :  { %v1100_v59 = vpop.f32.mrf.mxu1  ;;  %v637_v3 = vadd.f32 %v1063_v61, %v1023_v58 }
 0x1af   :  { %v1101_v4 = vadd.f32 %v1100_v59, %v1099_v56 }
 0x1b1   :  { %v712_v12 = vadd.f32 %v1101_v4, %v637_v3 }
 0x1b5   :  { %v1134_v46 = vpop.f32.mrf.mxu0  ;;  %v1172_v62 = vpop.f32.mrf.mxu1 }
 0x1b7   :  { %v1135_v0 = vpop.f32.mrf.mxu0  ;;  %v1173_v1 = vpop.f32.mrf.mxu1 }
 0x1b8   :  { %v1136_v5 = vadd.f32 %v1135_v0, %v1134_v46  ;;  %v1174_v9 = vadd.f32 %v1173_v1, %v1172_v62 }
 0x1b9   :  { %v1137_v6 = vpop.f32.mrf.mxu0  ;;  %v1175_v7 = vpop.f32.mrf.mxu1 }
 0x1ba   :  { %v782_v8 = vadd.f32 %v1136_v5, %v707_v2 }
 0x1bb   :  { %v1138_v10 = vpop.f32.mrf.mxu0  ;;  %v1176_v11 = vpop.f32.mrf.mxu1 }
 0x1bc   :  { %v857_v13 = vadd.f32 %v1174_v9, %v782_v8  ;;  %v1139_v14 = vadd.f32 %v1138_v10, %v1137_v6  ;;  %v1177_v18 = vadd.f32 %v1176_v11, %v1175_v7 }
 0x1be   :  { %v1024_v15 = vmul.f32 -1.442695, %v857_v13  ;;  %v787_v17 = vadd.f32 %v1139_v14, %v712_v12 }
 0x1c0   :  { %1193 = vpow2.f32 %v1024_v15  ;;  %v862_v19 = vadd.f32 %v1177_v18, %v787_v17 }
 0x1c2   :  { %v1025_v20 = vmul.f32 -1.442695, %v862_v19 }
 0x1c4   :  { %1195 = vpow2.f32 %v1025_v20 }
 0x1cd   :  { %v1194_v21 = vpop.eup %1193 }
 0x1ce   :  { %v871_v43 = vadd.f32 1.0, %v1194_v21 }
 0x1d0   :  { %1197 = vrcp.f32 %v871_v43 }
 0x1d1   :  { %v1196_v23 = vpop.eup %1195 }
 0x1d2   :  { %v872_v24 = vadd.f32 1.0, %v1196_v23 }
 0x1d4   :  { %1199 = vrcp.f32 %v872_v24 }
 0x1dd   :  { %v1198_v25 = vpop.eup %1197 }
 0x1de   :  { %878 = vst.msk [vmem:[%s1858_s5] sm:$0xff] %vm877_vm1, %v1198_v25  ;;  %912 = vperm.xlu1 %1187, %v1198_v25   ;;  %884 = vperm.xlu0 %1186, %v1198_v25  }
 0x1e1   :  { %v1200_v26 = vpop.eup %1199 }
 0x1e2   :  { %879 = vst.msk [vmem:[%s1858_s5 + $0x8] sm:$0xff] %vm877_vm1, %v1200_v26  ;;  %916 = vperm.xlu1 %1187, %v1200_v26   ;;  %1188 = vset.pattern.permute.xlu0 %v1226_v27  ;;  %s1228_s5 = smov [#allocation2]  }
 0x1e3   :  { %939 = vperm.xlu0 %1188, %v1198_v25   ;;  %s1002_s13 = sshll.u32 %s1228_s5, 4  ;;  %s1003_s13 = int_to_ptr.vmem [resolvable:$true] %s1002_s13 }
 0x1e4   :  { %s1201_s14 = scalar_lea.vmem %s1003_s13, 128  ;;  %p1206_p1 = scmp.lt.s32.totalorder %s1003_s13, %s1003_s13 }
 0x1e5   :  { %p1202_p0 = scmp.ne.s32.totalorder %s1003_s13, %s1201_s14  ;;  %p1207_p2 = scmp.lt.s32.totalorder %s1201_s14, %s1201_s14 }
 0x1e6   :  { %1190 = vset.pattern.permute.xlu1 %v1226_v27 }
 0x1e7   :  { %943 = vperm.xlu1 %1190, %v1200_v26   ;;  %1189 = vset.pattern.permute.xlu0 %v1225_v47  ;;  %p1208_p3 = por %p1207_p2, %p1206_p1 }
 0x1e8   :  { %889 = vperm.xlu0 %1189, %v1200_v26  }
 0x1e9   :  { %p1209_p4 = pnand %p1208_p3, %p1202_p0 }
 0x1eb   :  { %1191 = vset.pattern.permute.xlu1 %v1227_v28 }
 0x1ec   :  { %966 = vperm.xlu1 %1191, %v1198_v25   ;;  %1192 = vset.pattern.permute.xlu0 %v1227_v28 }
 0x1ed   :  { %970 = vperm.xlu0 %1192, %v1200_v26  }
 0x259   :  { %v913_v29 = vpop.permute.xlu1 %912  ;;  %v885_v30 = vpop.permute.xlu0 %884 }
 0x25a   :  { %v919_v31 = vmul.f32 %v913_v29, %v1317_v16  ;;  %v892_v32 = vmul.f32 %v885_v30, %v1317_v16 }
 0x25c   :  { %v921_v33 = vsel %vm99_vm0, %v919_v31, 0.0  ;;  %v894_v34 = vsel %vm99_vm0, %v892_v32, 0.0 }
 0x25d   :  { %v922_v35 = vrot.slane %v921_v33, 4  ;;  %v895_v36 = vrot.slane %v894_v34, 4  ;;  %v917_v37 = vpop.permute.xlu1 %916 }
 0x25e   :  { %v920_v38 = vmul.f32 %v917_v37, %v1338_v22  ;;  %v940_v39 = vpop.permute.xlu0 %939 }
 0x25f   :  { %v896_v41 = vadd.f32 %v895_v36, %v894_v34  ;;  %v946_v42 = vmul.f32 %v940_v39, %v1317_v16  ;;  %v923_v45 = vadd.f32 %v922_v35, %v921_v33 }
 0x260   :  { %v928_v44 = vsel %vm99_vm0, %v920_v38, 0.0 }
 0x261   :  { %v897_v48 = vrot.slane %v896_v41, 2  ;;  %v929_v50 = vrot.slane %v928_v44, 4  ;;  %v948_v47 = vsel %vm99_vm0, %v946_v42, 0.0  ;;  %v924_v58 = vrot.slane %v923_v45, 2 }
 0x262   :  { %v949_v51 = vrot.slane %v948_v47, 4  ;;  %v944_v52 = vpop.permute.xlu1 %943 }
 0x263   :  { %v930_v53 = vadd.f32 %v929_v50, %v928_v44  ;;  %v947_v54 = vmul.f32 %v944_v52, %v1338_v22  ;;  %v890_v55 = vpop.permute.xlu0 %889  ;;  %v898_v49 = vadd.f32 %v897_v48, %v896_v41  ;;  %v925_v4 = vadd.f32 %v924_v58, %v923_v45 }
 0x264   :  { %v950_v56 = vadd.f32 %v949_v51, %v948_v47  ;;  %v893_v57 = vmul.f32 %v890_v55, %v1338_v22 }
 0x265   :  { %v955_v59 = vsel %vm99_vm0, %v947_v54, 0.0  ;;  %v931_v60 = vrot.slane %v930_v53, 2  ;;  %v899_v5 = vrot.slane %v898_v49, 1  ;;  %v926_v17 = vrot.slane %v925_v4, 1 }
 0x266   :  { %v951_v61 = vrot.slane %v950_v56, 2  ;;  %v956_v46 = vrot.slane %v955_v59, 4  ;;  %v901_v62 = vsel %vm99_vm0, %v893_v57, 0.0 }
 0x267   :  { %v902_v63 = vrot.slane %v901_v62, 4  ;;  %v967_v0 = vpop.permute.xlu1 %966  ;;  %v932_v8 = vadd.f32 %v931_v60, %v930_v53  ;;  %v900_v20 = vadd.f32 %v899_v5, %v898_v49  ;;  %v927_v26 = vadd.f32 %v926_v17, %v925_v4 }
 0x268   :  { %v957_v1 = vadd.f32 %v956_v46, %v955_v59  ;;  %v973_v2 = vmul.f32 %v967_v0, %v1317_v16  ;;  %v971_v3 = vpop.permute.xlu0 %970  ;;  %v952_v9 = vadd.f32 %v951_v61, %v950_v56 }
 0x269   :  { %v903_v6 = vadd.f32 %v902_v63, %v901_v62  ;;  %v974_v7 = vmul.f32 %v971_v3, %v1338_v22  ;;  %v933_v21 = vrot.slane %v932_v8, 1  ;;  %v909_v30 = vsel %vm908_vm2, %v900_v20, 0.0 }
 0x26a   :  { %v958_v10 = vrot.slane %v957_v1, 2  ;;  %v975_v11 = vsel %vm99_vm0, %v973_v2, 0.0  ;;  %v953_v43 = vrot.slane %v952_v9, 1  ;;  %v936_v38 = vsel %vm935_vm3, %v927_v26, %v909_v30 }
 0x26b   :  { %v904_v12 = vrot.slane %v903_v6, 2  ;;  %v976_v13 = vrot.slane %v975_v11, 4  ;;  %v982_v14 = vsel %vm99_vm0, %v974_v7, 0.0  ;;  %v934_v31 = vadd.f32 %v933_v21, %v932_v8 }
 0x26c   :  { %v983_v15 = vrot.slane %v982_v14, 4  ;;  %v959_v18 = vadd.f32 %v958_v10, %v957_v1  ;;  %v954_v32 = vadd.f32 %v953_v43, %v952_v9 }
 0x26d   :  { %v905_v19 = vadd.f32 %v904_v12, %v903_v6  ;;  %v977_v16 = vadd.f32 %v976_v13, %v975_v11 }
 0x26e   :  { %v984_v23 = vadd.f32 %v983_v15, %v982_v14  ;;  %v960_v27 = vrot.slane %v959_v18, 1  ;;  %v963_v44 = vsel %vm962_vm4, %v954_v32, %v936_v38 }
 0x26f   :  { %v906_v22 = vrot.slane %v905_v19, 1  ;;  %v978_v24 = vrot.slane %v977_v16, 2 }
 0x270   :  { %v985_v25 = vrot.slane %v984_v23, 2  ;;  %v961_v39 = vadd.f32 %v960_v27, %v959_v18 }
 0x271   :  { %v907_v28 = vadd.f32 %v906_v22, %v905_v19  ;;  %v979_v29 = vadd.f32 %v978_v24, %v977_v16 }
 0x272   :  { %v986_v33 = vadd.f32 %v985_v25, %v984_v23 }
 0x273   :  { %v910_v34 = vsel %vm908_vm2, %v907_v28, 0.0  ;;  %v980_v35 = vrot.slane %v979_v29, 1 }
 0x274   :  { %v937_v36 = vsel %vm935_vm3, %v934_v31, %v910_v34  ;;  %v987_v37 = vrot.slane %v986_v33, 1 }
 0x275   :  { %v981_v41 = vadd.f32 %v980_v35, %v979_v29  ;;  %v964_v45 = vsel %vm962_vm4, %v961_v39, %v937_v36 }
 0x276   :  { %v988_v42 = vadd.f32 %v987_v37, %v986_v33 }
 0x277   :  { %v990_v48 = vsel %vm989_vm5, %v981_v41, %v963_v44 }
 0x278   :  { %v991_v50 = vsel %vm989_vm5, %v988_v42, %v964_v45  ;;  %993 = vst.msk [vmem:[#allocation2] sm:$0xf] %vm992_vm6, %v990_v48 }
 0x279   :  { %994 = vst.msk [vmem:[#allocation2 + $0x4] sm:$0xf] %vm992_vm6, %v991_v50 }
 0x27a   :  { %1212 = shalt.err (!%p1209_p4)
}
 0x27b   :  { %s1229_s15 = smov 64   ;;  %s1230_s16 = smov 4  }
 0x27c   :  { %1008 = dma.vmem_to_hbm [thread:$0]  %s1003_s13, 128, %s1859_s6, [#allocation3], %s1229_s15, %s1229_s15, %s1230_s16  }
 0x27d   :  { %1221 = dma.done.wait [#allocation3], 128  }
 0x27e   :  { %1222 = vsyncadd [#allocation3], 4294967168 }
 0x27f   :  { %1014 = vsyncpa [#allocation3], 1 }

</bundles_post_ra>
